<compile_context>
chip_gen: v5e
topology: v5e:2x2
jax: 0.10.0
libtpu: 0.0.40
codegen_flags: <defaults>
</compile_context>

<pallas_src>
import functools

import jax
import jax.numpy as jnp
from jax.experimental import pallas as pl
from jax.experimental.pallas import tpu as pltpu

_LANES = 128


def _round_up(x, m):
    return ((x + m - 1) // m) * m


def _criterion_kernel(rx_ref, tg_ref, mu_ref, lv_ref, out_ref, acc_ref,
                      *, n_elems, blocks_per_split, needs_mask):
    c = pl.program_id(0)          # split axis ("parallel": megacore on v7x)
    i = pl.program_id(1)          # row-block axis ("arbitrary": reduction)

    @pl.when(i == 0)
    def _():
        acc_ref[...] = jnp.zeros_like(acc_ref)

    rows, lanes = rx_ref.shape

    rx = rx_ref[...].astype(jnp.float32)
    tg = tg_ref[...].astype(jnp.float32)
    # PyTorch F.binary_cross_entropy clamps log() at -100 for numerical safety.
    log_x = jnp.maximum(jnp.log(rx), jnp.float32(-100.0))
    log_1mx = jnp.maximum(jnp.log(1.0 - rx), jnp.float32(-100.0))
    bce = -(tg * log_x + (1.0 - tg) * log_1mx)

    if needs_mask:
        # Only the (at most one) boundary / overhang block needs the iota mask;
        # every interior block takes the cheap unmasked VPU-add path at runtime.
        blk = c * blocks_per_split + i
        block_elems = rows * lanes
        start = blk * block_elems
        is_full = start + block_elems <= n_elems

        @pl.when(is_full)
        def _():
            acc_ref[...] += bce

        @pl.when(jnp.logical_not(is_full))
        def _():
            row_i = jax.lax.broadcasted_iota(jnp.int32, (rows, lanes), 0)
            col_i = jax.lax.broadcasted_iota(jnp.int32, (rows, lanes), 1)
            flat_idx = start + row_i * lanes + col_i
            acc_ref[...] += jnp.where(flat_idx < n_elems, bce,
                                      jnp.float32(0.0))
    else:
        # Lane-resident vector accumulator: pure VPU work every step.
        acc_ref[...] += bce

    @pl.when(i == pl.num_programs(1) - 1)
    def _():
        mu = mu_ref[...].astype(jnp.float32)
        lv = lv_ref[...].astype(jnp.float32)
        kl = 0.5 * jnp.sum(mu * mu + jnp.exp(lv) - lv - 1.0)
        # Single cross-lane (XLU) reduce per split; KL folded in on split 0 only.
        partial = jnp.sum(acc_ref[...]) + jnp.where(c == 0, kl, jnp.float32(0.0))
        out_ref[...] = jnp.full(out_ref.shape, partial, dtype=out_ref.dtype)


def _as_lane_slab(x):
    """Flatten to (rows, 128). Copy-free (pure reshape) when x.size % 128 == 0."""
    n = int(x.size)
    rows = pl.cdiv(n, _LANES)
    flat = x.reshape(-1)
    if rows * _LANES != n:
        # TODO(synk): unaligned tails still pay one small jnp.pad copy; a fully
        # zero-copy ragged-tail path would need a separate 1-D tail input.
        flat = jnp.pad(flat, (0, rows * _LANES - n))
    return flat.reshape(rows, _LANES), n


@functools.partial(jax.jit, static_argnames=("tile_rows", "n_splits"))
def criterion(recon_x, target, mu, log_var, *, tile_rows=1024, n_splits=2):
    """Pallas equivalent of models/vae.py::Criterion.forward (scalar output)."""
    rx2, n_elems = _as_lane_slab(recon_x)
    tg2, _ = _as_lane_slab(target)
    mu2 = mu.reshape(1, -1)          # tiny; held fully resident in VMEM
    lv2 = log_var.reshape(1, -1)

    rows = rx2.shape[0]
    tile_rows_eff = max(8, min(tile_rows, _round_up(rows, 8)))
    n_blocks = pl.cdiv(rows, tile_rows_eff)
    splits = max(1, min(n_splits, n_blocks))
    blocks_per_split = pl.cdiv(n_blocks, splits)

    # Masking is only required if (a) the logical elements don't exactly fill
    # the blocked layout, or (b) a split overhangs and re-reads the last block.
    needs_mask = (n_elems != n_blocks * tile_rows_eff * _LANES
                  or n_blocks % splits != 0)

    # Explicit scoped-VMEM budget: 2 inputs x 2 pipeline buffers + f32
    # accumulator + resident mu/log_var + output rows, with headroom.  Keeps
    # large tiles safe on v5e (16 MiB scoped default) and v7x (64 MiB physical).
    block_bytes = tile_rows_eff * _LANES * rx2.dtype.itemsize
    vmem_need = (2 * 2 * block_bytes
                 + tile_rows_eff * _LANES * 4
                 + int(mu2.size) * 4 + int(lv2.size) * 4
                 + splits * _LANES * 4)
    vmem_limit = int(min(48 * 2 ** 20, max(32 * 2 ** 20, 2 * vmem_need)))

    kernel = functools.partial(
        _criterion_kernel, n_elems=n_elems,
        blocks_per_split=blocks_per_split, needs_mask=needs_mask)

    def _row_block_map(c, i):
        # Clamp so the (at most one) overhanging block of the split never maps
        # outside the array; its contribution is fully masked in the kernel.
        return (jnp.minimum(c * blocks_per_split + i, n_blocks - 1), 0)

    out = pl.pallas_call(
        kernel,
        out_shape=jax.ShapeDtypeStruct((splits, _LANES), jnp.float32),
        grid=(splits, blocks_per_split),
        in_specs=[
            pl.BlockSpec((tile_rows_eff, _LANES), _row_block_map),
            pl.BlockSpec((tile_rows_eff, _LANES), _row_block_map),
            pl.BlockSpec(mu2.shape, lambda c, i: (0, 0)),
            pl.BlockSpec(lv2.shape, lambda c, i: (0, 0)),
        ],
        out_specs=pl.BlockSpec((1, _LANES), lambda c, i: (c, 0)),
        scratch_shapes=[pltpu.VMEM((tile_rows_eff, _LANES), jnp.float32)],
        compiler_params=pltpu.CompilerParams(
            dimension_semantics=("parallel", "arbitrary"),
            vmem_limit_bytes=vmem_limit,
        ),
    )(rx2, tg2, mu2, lv2)

    return jnp.sum(out[:, 0])


def _reference(recon_x, target, mu, log_var):
    rx = recon_x.astype(jnp.float32)
    tg = target.astype(jnp.float32)
    bce = -(tg * jnp.maximum(jnp.log(rx), -100.0)
            + (1.0 - tg) * jnp.maximum(jnp.log(1.0 - rx), -100.0))
    kl = 0.5 * jnp.sum(mu.astype(jnp.float32) ** 2
                       + jnp.exp(log_var.astype(jnp.float32))
                       - log_var.astype(jnp.float32) - 1.0)
    return jnp.sum(bce) + kl


if __name__ == "__main__":
    key = jax.random.PRNGKey(0)
    k1, k2, k3, k4 = jax.random.split(key, 4)

    B, C, H, W = 2, 4, 16, 16   # reconstructed image / target (VAE decoder output)
    Z = 32                      # latent dim for mu / log_var

    # recon_x must lie strictly in (0, 1) for BCE; target in [0, 1].
    recon_x = jax.random.uniform(k1, (B, C, H, W), jnp.float32,
                                 minval=1e-4, maxval=1.0 - 1e-4)
    target = jax.random.uniform(k2, (B, C, H, W), jnp.float32)
    mu = jax.random.normal(k3, (B, Z), jnp.float32)
    log_var = 0.1 * jax.random.normal(k4, (B, Z), jnp.float32)

    loss = criterion(recon_x, target, mu, log_var)
    loss = jax.block_until_ready(loss)

    ref = _reference(recon_x, target, mu, log_var)
    assert jnp.allclose(loss, ref, rtol=1e-5, atol=1e-3), (loss, ref)

    print("KERNEL_OK")
</pallas_src>

<mosaic_0001>
module attributes {stable_mosaic.version = 11 : i64} {
  func.func @_criterion_kernel(%arg0: i32, %arg1: i32, %arg2: memref<16x128xf32, #tpu.memory_space<vmem>>, %arg3: memref<16x128xf32, #tpu.memory_space<vmem>>, %arg4: memref<1x64xf32, #tpu.memory_space<vmem>>, %arg5: memref<1x64xf32, #tpu.memory_space<vmem>>, %arg6: memref<1x128xf32, #tpu.memory_space<vmem>>, %arg7: memref<16x128xf32, #tpu.memory_space<vmem>>) attributes {dimension_semantics = [#tpu.dimension_semantics<parallel>, #tpu.dimension_semantics<arbitrary>], iteration_bounds = array<i64: 1, 1>, scalar_prefetch = 0 : i64, scratch_operands = 1 : i64, tpu.core_type = #tpu.core_type<tc>, window_params = [{transform_indices = @transform_0, window_bounds = array<i64: 16, 128>}, {transform_indices = @transform_1, window_bounds = array<i64: 16, 128>}, {pipeline_mode = #tpu.pipeline_mode<synchronous>, transform_indices = @transform_2, window_bounds = array<i64: 1, 64>}, {pipeline_mode = #tpu.pipeline_mode<synchronous>, transform_indices = @transform_3, window_bounds = array<i64: 1, 64>}, {transform_indices = @transform_4, window_bounds = array<i64: 1, 128>}]} {
    %c0_i32 = arith.constant 0 : i32
    %0 = arith.cmpi eq, %arg1, %c0_i32 : i32
    %1 = arith.extui %0 : i1 to i32
    %c0_i32_0 = arith.constant 0 : i32
    %2 = arith.cmpi ne, %1, %c0_i32_0 : i32
    scf.if %2 {
      %cst_14 = arith.constant 0.000000e+00 : f32
      %26 = vector.broadcast %cst_14 : f32 to vector<16x128xf32>
      %c0_15 = arith.constant 0 : index
      %c0_16 = arith.constant 0 : index
      %27 = vector.load %arg7[%c0_15, %c0_16] : memref<16x128xf32, #tpu.memory_space<vmem>>, vector<16x128xf32>
      tpu.vector_store %arg7[%c0_15, %c0_16], %26 {strides = array<i32>} : memref<16x128xf32, #tpu.memory_space<vmem>>, vector<16x128xf32>,
    } else {
    }
    %c0 = arith.constant 0 : index
    %c0_1 = arith.constant 0 : index
    %3 = vector.load %arg2[%c0, %c0_1] : memref<16x128xf32, #tpu.memory_space<vmem>>, vector<16x128xf32>
    %c0_2 = arith.constant 0 : index
    %c0_3 = arith.constant 0 : index
    %4 = vector.load %arg3[%c0_2, %c0_3] : memref<16x128xf32, #tpu.memory_space<vmem>>, vector<16x128xf32>
    %5 = math.log %3 : vector<16x128xf32>
    %cst = arith.constant -1.000000e+02 : f32
    %6 = vector.broadcast %cst : f32 to vector<16x128xf32>
    %7 = arith.maximumf %5, %6 : vector<16x128xf32>
    %cst_4 = arith.constant 1.000000e+00 : f32
    %8 = vector.broadcast %cst_4 : f32 to vector<16x128xf32>
    %9 = arith.subf %8, %3 : vector<16x128xf32>
    %10 = math.log %9 : vector<16x128xf32>
    %cst_5 = arith.constant -1.000000e+02 : f32
    %11 = vector.broadcast %cst_5 : f32 to vector<16x128xf32>
    %12 = arith.maximumf %10, %11 : vector<16x128xf32>
    %13 = arith.mulf %4, %7 : vector<16x128xf32>
    %cst_6 = arith.constant 1.000000e+00 : f32
    %14 = vector.broadcast %cst_6 : f32 to vector<16x128xf32>
    %15 = arith.subf %14, %4 : vector<16x128xf32>
    %16 = arith.mulf %15, %12 : vector<16x128xf32>
    %17 = arith.addf %13, %16 : vector<16x128xf32>
    %cst_7 = arith.constant 0.000000e+00 : f32
    %18 = vector.broadcast %cst_7 : f32 to vector<16x128xf32>
    %19 = arith.subf %18, %17 : vector<16x128xf32>
    %c0_8 = arith.constant 0 : index
    %c0_9 = arith.constant 0 : index
    %20 = vector.load %arg7[%c0_8, %c0_9] : memref<16x128xf32, #tpu.memory_space<vmem>>, vector<16x128xf32>
    %21 = arith.addf %20, %19 : vector<16x128xf32>
    %c0_10 = arith.constant 0 : index
    %c0_11 = arith.constant 0 : index
    %22 = vector.load %arg7[%c0_10, %c0_11] : memref<16x128xf32, #tpu.memory_space<vmem>>, vector<16x128xf32>
    tpu.vector_store %arg7[%c0_10, %c0_11], %21 {strides = array<i32>} : memref<16x128xf32, #tpu.memory_space<vmem>>, vector<16x128xf32>,
    %c0_i32_12 = arith.constant 0 : i32
    %23 = arith.cmpi eq, %arg1, %c0_i32_12 : i32
    %24 = arith.extui %23 : i1 to i32
    %c0_i32_13 = arith.constant 0 : i32
    %25 = arith.cmpi ne, %24, %c0_i32_13 : i32
    scf.if %25 {
      %c0_14 = arith.constant 0 : index
      %c0_15 = arith.constant 0 : index
      %26 = vector.load %arg4[%c0_14, %c0_15] : memref<1x64xf32, #tpu.memory_space<vmem>>, vector<1x64xf32>
      %c0_16 = arith.constant 0 : index
      %c0_17 = arith.constant 0 : index
      %27 = vector.load %arg5[%c0_16, %c0_17] : memref<1x64xf32, #tpu.memory_space<vmem>>, vector<1x64xf32>
      %28 = arith.mulf %26, %26 : vector<1x64xf32>
      %29 = math.exp %27 : vector<1x64xf32>
      %30 = arith.addf %28, %29 : vector<1x64xf32>
      %31 = arith.subf %30, %27 : vector<1x64xf32>
      %cst_18 = arith.constant 1.000000e+00 : f32
      %32 = vector.broadcast %cst_18 : f32 to vector<1x64xf32>
      %33 = arith.subf %31, %32 : vector<1x64xf32>
      %34 = vector.shape_cast %33 : vector<1x64xf32> to vector<1x1x64xf32>
      %cst_19 = arith.constant dense<0.000000e+00> : vector<1xf32>
      %35 = vector.multi_reduction <add>, %34, %cst_19 [1, 2] : vector<1x1x64xf32> to vector<1xf32>
      %36 = vector.shape_cast %35 : vector<1xf32> to vector<1x1x1xf32>
      %37 = vector.extract %36[0, 0, 0] : f32 from vector<1x1x1xf32>
      %cst_20 = arith.constant 5.000000e-01 : f32
      %38 = arith.mulf %cst_20, %37 : f32
      %c0_21 = arith.constant 0 : index
      %c0_22 = arith.constant 0 : index
      %39 = vector.load %arg7[%c0_21, %c0_22] : memref<16x128xf32, #tpu.memory_space<vmem>>, vector<16x128xf32>
      %40 = vector.shape_cast %39 : vector<16x128xf32> to vector<1x16x128xf32>
      %cst_23 = arith.constant dense<0.000000e+00> : vector<1xf32>
      %41 = vector.multi_reduction <add>, %40, %cst_23 [1, 2] : vector<1x16x128xf32> to vector<1xf32>
      %42 = vector.shape_cast %41 : vector<1xf32> to vector<1x1x1xf32>
      %43 = vector.extract %42[0, 0, 0] : f32 from vector<1x1x1xf32>
      %c0_i32_24 = arith.constant 0 : i32
      %44 = arith.cmpi eq, %arg0, %c0_i32_24 : i32
      %cst_25 = arith.constant 0.000000e+00 : f32
      %45 = arith.select %44, %38, %cst_25 : f32
      %46 = arith.addf %43, %45 : f32
      %47 = vector.broadcast %46 : f32 to vector<1x128xf32>
      %c0_26 = arith.constant 0 : index
      %c0_27 = arith.constant 0 : index
      %48 = vector.load %arg6[%c0_26, %c0_27] : memref<1x128xf32, #tpu.memory_space<vmem>>, vector<1x128xf32>
      tpu.vector_store %arg6[%c0_26, %c0_27], %47 {strides = array<i32>} : memref<1x128xf32, #tpu.memory_space<vmem>>, vector<1x128xf32>,
    } else {
    }
    return
  }
  func.func @transform_0(%arg0: i32, %arg1: i32) -> (i32, i32) {
    %c1_i32 = arith.constant 1 : i32
    %0 = arith.muli %arg0, %c1_i32 : i32
    %1 = arith.addi %0, %arg1 : i32
    %c0_i32 = arith.constant 0 : i32
    %2 = arith.minsi %1, %c0_i32 : i32
    %c0_i32_0 = arith.constant 0 : i32
    %c0_i32_1 = arith.constant 0 : i32
    return %2, %c0_i32_0 : i32, i32
  }
  func.func @transform_1(%arg0: i32, %arg1: i32) -> (i32, i32) {
    %c1_i32 = arith.constant 1 : i32
    %0 = arith.muli %arg0, %c1_i32 : i32
    %1 = arith.addi %0, %arg1 : i32
    %c0_i32 = arith.constant 0 : i32
    %2 = arith.minsi %1, %c0_i32 : i32
    %c0_i32_0 = arith.constant 0 : i32
    %c0_i32_1 = arith.constant 0 : i32
    return %2, %c0_i32_0 : i32, i32
  }
  func.func @transform_2(%arg0: i32, %arg1: i32) -> (i32, i32) {
    %c0_i32 = arith.constant 0 : i32
    %c0_i32_0 = arith.constant 0 : i32
    %c0_i32_1 = arith.constant 0 : i32
    return %c0_i32, %c0_i32_0 : i32, i32
  }
  func.func @transform_3(%arg0: i32, %arg1: i32) -> (i32, i32) {
    %c0_i32 = arith.constant 0 : i32
    %c0_i32_0 = arith.constant 0 : i32
    %c0_i32_1 = arith.constant 0 : i32
    return %c0_i32, %c0_i32_0 : i32, i32
  }
  func.func @transform_4(%arg0: i32, %arg1: i32) -> (i32, i32) {
    %c0_i32 = arith.constant 0 : i32
    %c0_i32_0 = arith.constant 0 : i32
    return %arg0, %c0_i32 : i32, i32
  }
}

</mosaic_0001>

<bundles_post_ra>
// kernel: criterion.1
= control target key start
LH: loop header
LB: loop body
LE: loop exit
PB: predicated region body
PF: predicated region fallthrough
CT: control target
= control target key end

     0   :  { %s279_s0 = inlined_call_operand.vmem [shape: f32[16,128], index: 0, kind: input, shape index: {}]   ;;  %s280_s1 = inlined_call_operand.vmem [shape: f32[16,128], index: 1, kind: input, shape index: {}]   ;;  %s281_s2 = inlined_call_operand.vmem [shape: f32[1,64], index: 2, kind: input, shape index: {}]   ;;  %s282_s3 = inlined_call_operand.vmem [shape: f32[1,64], index: 3, kind: input, shape index: {}]   ;;  %s283_s4 = inlined_call_operand.hbm [shape: f32[1,128], index: 4, kind: output, shape index: {}]  }
   0x1   :  { %v126_v0 = vld [vmem:[%s282_s3] sm:$0x1]  ;;  %v89_v3 = vld [vmem:[%s279_s0 + $0x8] sm:$0xff] }
   0x2   :  { %v88_v1 = vld [vmem:[%s279_s0] sm:$0xff]  ;;  %v128_v2 = vmul.f32 1.442695, %v126_v0  ;;  %v99_v5 = vsub.f32 1.0, %v89_v3 }
   0x3   :  { %196 = vlog2.f32 %v88_v1  ;;  %v98_v4 = vsub.f32 1.0, %v88_v1 }
   0x4   :  { %198 = vlog2.f32 %v89_v3 }
   0x5   :  { %9 = vsyncpa [#allocation4], 0  ;;  %v125_v6 = vld [vmem:[%s281_s2] sm:$0x1]  ;;  %200 = vpow2.f32 %v128_v2  ;;  %v91_v13 = vld [vmem:[%s280_s1 + $0x8] sm:$0xff]  ;;  %vm133_vm0 = vcmask 516096  }
   0x6   :  { %202 = vlog2.f32 %v98_v4  ;;  %v127_v7 = vmul.f32 %v125_v6, %v125_v6  ;;  %v90_v10 = vld [vmem:[%s280_s1] sm:$0xff]  ;;  %v109_v24 = vsub.f32 1.0, %v91_v13  ;;  %s232_s2 = smov [#allocation3]   ;;  %s169_s29 = sshll.u32 %s283_s4, 4  ;;  %s170_s29 = int_to_ptr.hbm [resolvable:$true] %s169_s29 }
   0x7   :  { %204 = vlog2.f32 %v99_v5  ;;  %v108_v21 = vsub.f32 1.0, %v90_v10  ;;  %s167_s25 = sshll.u32 %s232_s2, 4  ;;  %s168_s25 = int_to_ptr.vmem [resolvable:$true] %s167_s25 }
   0x9   :  { %v197_v8 = vpop.eup %196 }
   0xa   :  { %v199_v9 = vpop.eup %198  ;;  %v93_v11 = vmul.f32 0.6931472, %v197_v8 }
   0xb   :  { %v201_v12 = vpop.eup %200  ;;  %v95_v14 = vmul.f32 0.6931472, %v199_v9 }
   0xc   :  { %v203_v15 = vpop.eup %202  ;;  %v130_v16 = vadd.f32 %v201_v12, %v127_v7  ;;  %v96_v17 = vmax.f32 %v93_v11, -100.0 }
   0xd   :  { %v205_v18 = vpop.eup %204  ;;  %v97_v19 = vmax.f32 %v95_v14, -100.0  ;;  %v101_v20 = vmul.f32 0.6931472, %v203_v15 }
   0xe   :  { %v131_v22 = vsub.f32 %v130_v16, %v126_v0  ;;  %v103_v23 = vmul.f32 0.6931472, %v205_v18  ;;  %v106_v26 = vmul.f32 %v96_v17, %v90_v10 }
   0xf   :  { %v104_v25 = vmax.f32 %v101_v20, -100.0  ;;  %v107_v29 = vmul.f32 %v97_v19, %v91_v13 }
  0x10   :  { %v190_v27 = vadd.f32 -1.0, %v131_v22  ;;  %v105_v28 = vmax.f32 %v103_v23, -100.0 }
  0x11   :  { %v110_v30 = vmul.f32 %v108_v21, %v104_v25 }
  0x12   :  { %v134_v31 = vsel %vm133_vm0, %v190_v27, 0.0  ;;  %v111_v32 = vmul.f32 %v109_v24, %v105_v28 }
  0x13   :  { %135 = vadd.xlane.f32.xlu0 %v134_v31  ;;  %v112_v33 = vadd.f32 %v110_v30, %v106_v26 }
  0x14   :  { %v113_v34 = vadd.f32 %v111_v32, %v107_v29 }
  0x15   :  { %v114_v35 = vsub.f32 0.0, %v112_v33 }
  0x16   :  { %v115_v36 = vsub.f32 0.0, %v113_v34 }
  0x18   :  { %v147_v37 = vadd.f32 %v115_v36, %v114_v35 }
  0x1b   :  { %148 = vadd.xlane.f32.xlu0 %v147_v37 }
  0x86   :  { %v136_v38 = vpop.xlane.xlu0 %135 }
  0x87   :  { %v137_v39 = vrot.slane %v136_v38, 4 }
  0x89   :  { %v138_v40 = vadd.f32 %v137_v39, %v136_v38 }
  0x8b   :  { %v139_v41 = vrot.slane %v138_v40, 2 }
  0x8d   :  { %v140_v42 = vadd.f32 %v139_v41, %v138_v40 }
  0x8e   :  { %v149_v43 = vpop.xlane.xlu0 %148 }
  0x8f   :  { %v150_v44 = vrot.slane %v149_v43, 4  ;;  %v141_v45 = vrot.slane %v140_v42, 1 }
  0x91   :  { %v151_v46 = vadd.f32 %v150_v44, %v149_v43  ;;  %v142_v47 = vadd.f32 %v141_v45, %v140_v42 }
  0x93   :  { %v152_v48 = vrot.slane %v151_v46, 2  ;;  %191 = vpush %v142_v47 }
  0x95   :  { %v153_v49 = vadd.f32 %v152_v48, %v151_v46 }
  0x97   :  { %v154_v50 = vrot.slane %v153_v49, 1 }
  0x99   :  { %v155_v51 = vadd.f32 %v154_v50, %v153_v49 }
  0x9b   :  { %193 = vpush %v155_v51 }
  0xc4   :  { %s192_s1 = spop %191 }
  0xc5   :  { %s144_s26 = smul.f32 0.5, %s192_s1 }
  0xcc   :  { %s194_s30 = spop %193 }
  0xcd   :  { %s159_s5 = sadd.f32 %s194_s30, %s144_s26 }
  0xcf   :  { %v160_v52 = vstv %s159_s5 }
  0xd0   :  { %161 = vst [vmem:[#allocation3] sm:$0x1] %v160_v52 }
  0xd1   :  { %172 = dma.vmem_to_hbm [thread:$0]  %s168_s25, 16, %s170_s29, [#allocation4]  }
  0xd2   :  { %230 = dma.done.wait [#allocation4], 16  }
  0xd3   :  { %231 = vsyncadd [#allocation4], 4294967280 }
  0xd4   :  { %177 = vsyncpa [#allocation4], 1 }

</bundles_post_ra>
